<compile_context>
chip_gen: v7x
topology: tpu7x:2x2x1
jax: 0.10.0
libtpu: 0.0.40
codegen_flags: <defaults>
</compile_context>

<pallas_src>
import functools

import jax
import jax.numpy as jnp
import numpy as np
from jax.experimental import pallas as pl
from jax.experimental.pallas import tpu as pltpu

# rinna/japanese-gpt2-medium SentencePiece vocab size
VOCAB_SIZE = 32000


def _pgloss_kernel(preds_ref, tgt_ref, rew_ref, out_ref, row_acc_ref):
    j = pl.program_id(1)           # vocab-block index (reduction axis, last)
    nj = pl.num_programs(1)

    # zero the per-row probability accumulator at the start of each vocab sweep
    @pl.when(j == 0)
    def _():
        row_acc_ref[...] = jnp.zeros_like(row_acc_ref)

    tn, tv = preds_ref.shape
    # one-hot via iota == target (no materialized (N, V) one-hot anywhere)
    col_ids = j * tv + jax.lax.broadcasted_iota(jnp.int32, (tn, tv), 1)
    mask = col_ids == tgt_ref[...]                       # (tn,1) -> (tn,tv)

    # gather the target probability for each row; exactly one non-zero per
    # row across the whole vocab sweep, so summing in the input dtype is exact
    gathered = jnp.sum(
        jnp.where(mask, preds_ref[...], 0.0), axis=-1, keepdims=True
    )
    row_acc_ref[...] += gathered.astype(jnp.float32)

    # end of the vocab sweep for this row block: log once on (tn,1), fold
    # rewards, emit per-row loss
    @pl.when(j == nj - 1)
    def _():
        out_ref[...] = (-jnp.log(row_acc_ref[...]) * rew_ref[...]).astype(
            out_ref.dtype
        )


def pg_loss(preds, targets, rewards, *, row_tile=256, vocab_tile=6400):
    """preds: (B, S, V) float, targets: (B, S) int, rewards: (B, S) float."""
    B, S, V = preds.shape
    N = B * S

    preds2 = preds.reshape(N, V)
    tgt2 = targets.reshape(N, 1).astype(jnp.int32)
    rew2 = rewards.reshape(N, 1).astype(jnp.float32)

    # ---- row tiling: bounded tile, pad remainder (never silently drop) ----
    if N <= row_tile:
        tn = N                      # full-extent block is always legal
        n_pad = N
    else:
        tn = row_tile
        n_pad = pl.cdiv(N, tn) * tn

    # ---- vocab tiling: 128-multiple tile, pad remainder with zeros ----
    tv = vocab_tile
    if V < tv:
        tv = ((V + 127) // 128) * 128
    v_pad = pl.cdiv(V, tv) * tv

    if n_pad != N or v_pad != V:
        # padded rows: preds=1 (gathered prob 1 -> log 0), reward=0, target=0
        # padded vocab columns: preds=0 (never selected by the one-hot mask)
        preds2 = jnp.pad(
            preds2,
            ((0, n_pad - N), (0, v_pad - V)),
            constant_values=1.0,
        )
        if v_pad != V:
            # zero out the padded vocab columns for the real rows too
            preds2 = preds2.at[:, V:].set(0.0)
        tgt2 = jnp.pad(tgt2, ((0, n_pad - N), (0, 0)), constant_values=0)
        rew2 = jnp.pad(rew2, ((0, n_pad - N), (0, 0)), constant_values=0.0)

    grid = (n_pad // tn, v_pad // tv)

    per_row = pl.pallas_call(
        _pgloss_kernel,
        out_shape=jax.ShapeDtypeStruct((n_pad, 1), jnp.float32),
        grid_spec=pltpu.PrefetchScalarGridSpec(
            num_scalar_prefetch=0,
            grid=grid,
            in_specs=[
                pl.BlockSpec((tn, tv), lambda i, j: (i, j)),   # preds
                pl.BlockSpec((tn, 1), lambda i, j: (i, 0)),    # targets
                pl.BlockSpec((tn, 1), lambda i, j: (i, 0)),    # rewards
            ],
            out_specs=pl.BlockSpec((tn, 1), lambda i, j: (i, 0)),
            scratch_shapes=[pltpu.VMEM((tn, 1), jnp.float32)],
        ),
        compiler_params=pltpu.CompilerParams(
            # output block depends only on the row axis -> row axis parallel
            # (megacore sharding on v7x); vocab axis is the reduction.
            dimension_semantics=("parallel", "arbitrary"),
            vmem_limit_bytes=32 * 1024 * 1024,
        ),
    )(preds2, tgt2, rew2)

    # finish the mean over the true N rows (padded rows contribute exactly 0)
    return jnp.sum(per_row[:N, 0]) / N


def pg_loss_ref(preds, targets, rewards):
    onehot = jax.nn.one_hot(targets, VOCAB_SIZE, dtype=preds.dtype)
    loss = -(jnp.log(preds) * onehot).sum(-1) * rewards
    return loss.mean()


if __name__ == "__main__":
    key = jax.random.PRNGKey(0)
    k1, k2, k3 = jax.random.split(key, 3)

    B, S = 2, 8
    logits = jax.random.normal(k1, (B, S, VOCAB_SIZE), dtype=jnp.float32)
    preds = jax.nn.softmax(logits, axis=-1)                      # valid probabilities
    targets = jax.random.randint(k2, (B, S), 0, VOCAB_SIZE, dtype=jnp.int32)
    rewards = jax.random.uniform(k3, (B, S), dtype=jnp.float32)

    out = jax.block_until_ready(pg_loss(preds, targets, rewards))
    ref = jax.block_until_ready(pg_loss_ref(preds, targets, rewards))

    np.testing.assert_allclose(np.asarray(out), np.asarray(ref), rtol=1e-5, atol=1e-5)
    print("KERNEL_OK")
</pallas_src>

<mosaic_0001>
module attributes {stable_mosaic.version = 11 : i64} {
  func.func @_pgloss_kernel(%arg0: i32, %arg1: i32, %arg2: memref<16x6400xf32, #tpu.memory_space<vmem>>, %arg3: memref<16x1xi32, #tpu.memory_space<vmem>>, %arg4: memref<16x1xf32, #tpu.memory_space<vmem>>, %arg5: memref<16x1xf32, #tpu.memory_space<vmem>>, %arg6: memref<16x1xf32, #tpu.memory_space<vmem>>) attributes {dimension_semantics = [#tpu.dimension_semantics<parallel>, #tpu.dimension_semantics<arbitrary>], iteration_bounds = array<i64: 1, 5>, scalar_prefetch = 0 : i64, scratch_operands = 1 : i64, tpu.core_type = #tpu.core_type<tc>, window_params = [{transform_indices = @transform_0, window_bounds = array<i64: 16, 6400>}, {transform_indices = @transform_1, window_bounds = array<i64: 16, 1>}, {transform_indices = @transform_2, window_bounds = array<i64: 16, 1>}, {transform_indices = @transform_3, window_bounds = array<i64: 16, 1>}]} {
    %c0_i32 = arith.constant 0 : i32
    %0 = arith.cmpi eq, %arg1, %c0_i32 : i32
    %1 = arith.extui %0 : i1 to i32
    %c0_i32_0 = arith.constant 0 : i32
    %2 = arith.cmpi ne, %1, %c0_i32_0 : i32
    scf.if %2 {
      %cst_10 = arith.constant 0.000000e+00 : f32
      %21 = vector.broadcast %cst_10 : f32 to vector<16x1xf32>
      %c0_11 = arith.constant 0 : index
      %c0_12 = arith.constant 0 : index
      %22 = vector.load %arg6[%c0_11, %c0_12] : memref<16x1xf32, #tpu.memory_space<vmem>>, vector<16x1xf32>
      tpu.vector_store %arg6[%c0_11, %c0_12], %21 {strides = array<i32>} : memref<16x1xf32, #tpu.memory_space<vmem>>, vector<16x1xf32>,
    } else {
    }
    %c6400_i32 = arith.constant 6400 : i32
    %3 = arith.muli %arg1, %c6400_i32 : i32
    %4 = tpu.iota {dimensions = array<i32: 1>} : vector<16x6400xi32>
    %5 = vector.broadcast %3 : i32 to vector<16x6400xi32>
    %6 = arith.addi %5, %4 : vector<16x6400xi32>
    %c0 = arith.constant 0 : index
    %c0_1 = arith.constant 0 : index
    %7 = vector.load %arg3[%c0, %c0_1] : memref<16x1xi32, #tpu.memory_space<vmem>>, vector<16x1xi32>
    %8 = vector.broadcast %7 : vector<16x1xi32> to vector<16x6400xi32>
    %9 = arith.cmpi eq, %6, %8 : vector<16x6400xi32>
    %c0_2 = arith.constant 0 : index
    %c0_3 = arith.constant 0 : index
    %10 = vector.load %arg2[%c0_2, %c0_3] : memref<16x6400xf32, #tpu.memory_space<vmem>>, vector<16x6400xf32>
    %cst = arith.constant 0.000000e+00 : f32
    %11 = vector.broadcast %cst : f32 to vector<16x6400xf32>
    %12 = arith.select %9, %10, %11 : vector<16x6400xi1>, vector<16x6400xf32>
    %cst_4 = arith.constant dense<0.000000e+00> : vector<16xf32>
    %13 = vector.multi_reduction <add>, %12, %cst_4 [1] : vector<16x6400xf32> to vector<16xf32>
    %14 = vector.shape_cast %13 : vector<16xf32> to vector<16x1xf32>
    %c0_5 = arith.constant 0 : index
    %c0_6 = arith.constant 0 : index
    %15 = vector.load %arg6[%c0_5, %c0_6] : memref<16x1xf32, #tpu.memory_space<vmem>>, vector<16x1xf32>
    %16 = arith.addf %15, %14 : vector<16x1xf32>
    %c0_7 = arith.constant 0 : index
    %c0_8 = arith.constant 0 : index
    %17 = vector.load %arg6[%c0_7, %c0_8] : memref<16x1xf32, #tpu.memory_space<vmem>>, vector<16x1xf32>
    tpu.vector_store %arg6[%c0_7, %c0_8], %16 {strides = array<i32>} : memref<16x1xf32, #tpu.memory_space<vmem>>, vector<16x1xf32>,
    %c4_i32 = arith.constant 4 : i32
    %18 = arith.cmpi eq, %arg1, %c4_i32 : i32
    %19 = arith.extui %18 : i1 to i32
    %c0_i32_9 = arith.constant 0 : i32
    %20 = arith.cmpi ne, %19, %c0_i32_9 : i32
    scf.if %20 {
      %c0_10 = arith.constant 0 : index
      %c0_11 = arith.constant 0 : index
      %21 = vector.load %arg6[%c0_10, %c0_11] : memref<16x1xf32, #tpu.memory_space<vmem>>, vector<16x1xf32>
      %22 = math.log %21 : vector<16x1xf32>
      %cst_12 = arith.constant 0.000000e+00 : f32
      %23 = vector.broadcast %cst_12 : f32 to vector<16x1xf32>
      %24 = arith.subf %23, %22 : vector<16x1xf32>
      %c0_13 = arith.constant 0 : index
      %c0_14 = arith.constant 0 : index
      %25 = vector.load %arg4[%c0_13, %c0_14] : memref<16x1xf32, #tpu.memory_space<vmem>>, vector<16x1xf32>
      %26 = arith.mulf %24, %25 : vector<16x1xf32>
      %c0_15 = arith.constant 0 : index
      %c0_16 = arith.constant 0 : index
      %27 = vector.load %arg5[%c0_15, %c0_16] : memref<16x1xf32, #tpu.memory_space<vmem>>, vector<16x1xf32>
      tpu.vector_store %arg5[%c0_15, %c0_16], %26 {strides = array<i32>} : memref<16x1xf32, #tpu.memory_space<vmem>>, vector<16x1xf32>,
    } else {
    }
    return
  }
  func.func @transform_0(%arg0: i32, %arg1: i32) -> (i32, i32) {
    %c0_i32 = arith.constant 0 : i32
    return %arg0, %arg1 : i32, i32
  }
  func.func @transform_1(%arg0: i32, %arg1: i32) -> (i32, i32) {
    %c0_i32 = arith.constant 0 : i32
    %c0_i32_0 = arith.constant 0 : i32
    return %arg0, %c0_i32 : i32, i32
  }
  func.func @transform_2(%arg0: i32, %arg1: i32) -> (i32, i32) {
    %c0_i32 = arith.constant 0 : i32
    %c0_i32_0 = arith.constant 0 : i32
    return %arg0, %c0_i32 : i32, i32
  }
  func.func @transform_3(%arg0: i32, %arg1: i32) -> (i32, i32) {
    %c0_i32 = arith.constant 0 : i32
    %c0_i32_0 = arith.constant 0 : i32
    return %arg0, %c0_i32 : i32, i32
  }
}

</mosaic_0001>

<bundles_post_ra>
// kernel: tpu_custom_call.1
= control target key start
LH: loop header
LB: loop body
LE: loop exit
PB: predicated region body
PF: predicated region fallthrough
CT: control target
= control target key end

     0   :  { %8 = vsyncpa [#allocation4], 0  ;;  %s1925_s0 = inlined_call_operand.hbm [shape: f32[16,32000], index: 0, kind: input, shape index: {}]   ;;  %s1926_s1 = inlined_call_operand.vmem [shape: s32[16,1], index: 1, kind: input, shape index: {}]   ;;  %s1927_s2 = inlined_call_operand.vmem [shape: f32[16,1], index: 2, kind: input, shape index: {}]   ;;  %s1928_s3 = inlined_call_operand.vmem [shape: f32[16,1], index: 3, kind: output, shape index: {}]  }
   0x1   :  { %10 = vsyncpa [#allocation4 + $0x1], 0  ;;  %s1095_s12 = smov 0   ;;  %s1097_s13 = smov 0  }
   0x2   :  { %s1099_s14 = smov 0   ;;  %s1101_s15 = smov 0  }
   0x3   :  { %s1103_s16 = smov 0   ;;  %s1105_s17 = smov 0  }
   0x4 LB: > { %s906_s18 = sadd.s32 4294967295, %s1067_s17   ;;  %s25_s19 = sadd.s32 1, %s1063_s16  ;;  %s1067_s17 = sphi %s1105_s17, %s16_s17   ;;  %s1063_s16 = sphi %s1103_s16, %s1961_s16   ;;  %s1059_s15 = sphi %s1101_s15, %s1960_s15   ;;  %s1055_s14 = sphi %s1099_s14, %s1959_s14   ;;  %s1051_s13 = sphi %s1097_s13, %s1958_s13   ;;  %s1047_s12 = sphi %s1095_s12, %s1957_s12  }
   0x5   : > { %p26_p0 = scmp.ge.s32.totalorder %s25_s19, 5  ;;  %s37_s20 = sadd.s32 1, %s1055_s14 }
   0x6   : > { %p44_p1 = scmp.ne.s32.totalorder %s1055_s14, %s1051_s13  ;;  %p45_p2 = scmp.eq.s32.totalorder %s1067_s17, 0 }
   0x7   : > { %s1963_s19 = smov (%p26_p0, %s25_s19), 0  ;;  %p50_p4 = scmp.ne.s32.totalorder %s1051_s13, %s1047_s12 }
   0x8   : > { %p46_p3 = por %p45_p2, %p44_p1  ;;  %s33_s21 = ssub.s32 %s1063_s16, %s1963_s19 }
   0x9   : > { %p51_p5 = scmp.eq.s32.totalorder %s906_s18, 0  ;;  %p35_p6 = scmp.eq.s32.totalorder %s33_s21, 0 }
   0xa   : > { %p928_p8 = scmp.lt.s32.totalorder %s1067_s17, 5  ;;  %s170_s24 = sand.u32 1, %s1055_s14  }
   0xb   : > { %p1134_p7 = por %p51_p5, %p50_p4  ;;  %s919_s25 = smul.u32 6400, %s1063_s16 }
   0xc   : > { %s1140_s23 = scalar_select %p35_p6, %s1055_s14, %s37_s20  }
   0xd   : > { %s920_s26 = smul.u32 800, %s170_s24  ;;  %s1147_s29 = scalar_lea.hbm %s1925_s0, %s919_s25 }
   0xe   : > { %p1149_p9 = pnand %p928_p8, %p46_p3  ;;  %s1156_s6 = scalar_lea.sflag [#allocation4], %s170_s24 }
   0xf   : > { %s174_s4 = scalar_lea.vmem [#allocation3], %s920_s26  ;;  %s987_s7 = scalar_lea.hbm %s1147_s29, 12800 }
  0x10   : > { %s184_s5 = sshll.u32 %s174_s4, 4  ;;  %p988_p11 = scmp.ne.s32.totalorder %s1147_s29, %s987_s7  ;;  %s1153_s5 = int_to_ptr.vmem [resolvable:$true] %s184_s5 }
  0x11   : > { %p989_p12 = pneg %p1149_p9  ;;  %s992_s10 = scalar_lea.hbm %s1925_s0, 64000 }
  0x12   : > { %p993_p1 = scmp.lt.u32.totalorder %s1147_s29, %s1925_s0  ;;  %p994_p2 = scmp.lt.u32.totalorder %s992_s10, %s987_s7 }
  0x13   : > { %p990_p13 = pnand %p989_p12, %p988_p11  ;;  %p996_p4 = scmp.lt.u32.totalorder %s987_s7, %s1147_s29 }
  0x14   : > { %p995_p3 = por %p994_p2, %p993_p1 }
  0x15   : > { %p991_p0 = pneg %p990_p13 }
  0x16   : > { %p997_p5 = por %p996_p4, %p995_p3 }
  0x18   : > { %p998_p6 = pnand %p997_p5, %p991_p0 }
  0x1a   : > { %1001 = shalt.err (!%p998_p6)
}
  0x1b   : > { %s1002_s18 = scalar_lea.vmem %s1153_s5, 12800  ;;  %s1069_s20 = smov [#allocation3]  }
  0x1c   : > { %p1003_p8 = scmp.ne.s32.totalorder %s1153_s5, %s1002_s18  ;;  %s1007_s21 = sshll.u32 %s1069_s20, 4  ;;  %s1008_s21 = int_to_ptr.vmem [resolvable:$false] %s1007_s21 }
  0x1d   : > { %s1009_s24 = scalar_lea.vmem %s1008_s21, 25600  ;;  %p1010_p10 = scmp.lt.s32.totalorder %s1153_s5, %s1008_s21 }
  0x1e   : > { %p1005_p11 = pnand %p1003_p8, %p989_p12  ;;  %p1011_p1 = scmp.lt.s32.totalorder %s1009_s24, %s1002_s18 }
  0x20   : > { %p1006_p13 = pneg %p1005_p11  ;;  %p1012_p2 = por %p1011_p1, %p1010_p10 }
  0x22   : > { %p1013_p3 = pnand %p1012_p2, %p1006_p13 }
  0x24   : > { %1016 = shalt.err (!%p1013_p3)
}
  0x25   : > { %s1070_s25 = smov 32000   ;;  %s1071_s26 = smov 6400  }
  0x26   : > { %s1072_s27 = smov 400   ;;  %p192_p12 = scmp.lt.s32.totalorder %s1067_s17, 6 }
  0x27   : > { %927 = dma.hbm_to_vmem [thread:$0]  (!%p1149_p9), %s1147_s29, 12800, %s1153_s5, %s1156_s6, %s1070_s25, %s1071_s26, %s1072_s27  }
  0x28   : > { %p1931_p0 = scmp.ge.s32.totalorder %s1067_s17, 1 }
  0x2a   : > { %p193_p4 = pnand %p1931_p0, %p192_p12 }
  0x2b   : > { %s198_s28 = sand.u32 (!%p193_p4), 1, %s1051_s13  }
  0x2c   : > { %196 = sbr.rel (%p193_p4) target bundleno = 486 (0x1e6), region = 32  ;;  %s199_s7 = scalar_lea.sflag (!%p193_p4), [#allocation4], %s198_s28 }
  0x2d   : > { %s921_s4 = smul.u32 (!%p193_p4), 800, %s198_s28 }
  0x2f   : > { %s1188_s8 = scalar_lea.vmem (!%p193_p4), [#allocation3], %s921_s4 }
  0x33   : > { %1042 = dma.done.wait (%p1134_p7), %s199_s7, 12800  }
  0x34   : > { %1044 = vsyncadd (%p1134_p7), %s199_s7, 4294954496  ;;  %p913_p10 = scmp.ne.s32.totalorder %s1059_s15, 0 }
  0x35   : > { %vm259_vm0 = vcmask (!%p913_p10), 7168   ;;  %v1073_v0 = vmov (!%p913_p10), 0.0  }
  0x36   : > { %258 = sbr.rel (%p913_p10) target bundleno = 61 (0x3d), region = 40  ;;  %260 = vst.msk [vmem:[#allocation2] sm:$0xff] (!%p913_p10), %vm259_vm0, %v1073_v0  ;;  %261 = vst.msk [vmem:[#allocation2 + $0x8] sm:$0xff] (!%p913_p10), %vm259_vm0, %v1073_v0 }
  0x3d PF: > { %v365_v1 = vld [vmem:[%s1926_s1] sm:$0xff]  ;;  %v1074_v2 = vmov 0   ;;  %v366_v3 = vld [vmem:[%s1926_s1 + $0x8] sm:$0xff]  ;;  %v263_v4 = vlaneseq  ;;  %s262_s22 = smul.u32 6400, %s1059_s15  ;;  %v473_v49 = vld [vmem:[%s1188_s8] sm:$0xff]  ;;  %p914_p7 = scmp.ne.s32.totalorder %s1059_s15, 4 }
  0x3e   : > { %982 = vset.pattern.permute.xlu0 %v1074_v2  ;;  %v474_v50 = vld [vmem:[%s1188_s8 + $0x8] sm:$0xff]  ;;  %v475_v59 = vld [vmem:[%s1188_s8 + $0x10] sm:$0xff]  ;;  %v476_v62 = vld [vmem:[%s1188_s8 + $0x18] sm:$0xff] }
  0x3f   : > { %368 = vperm.xlu0 %982, %v365_v1   ;;  %v1202_v5 = vand.u32 127, %v263_v4  ;;  %v1207_v9 = vstv %s262_s22  ;;  %v477_v4 = vld [vmem:[%s1188_s8 + $0x20] sm:$0xff] }
  0x41   : > { %v297_v6 = vadd.s32 4224, %v1202_v5  ;;  %v298_v7 = vadd.s32 4352, %v1202_v5  ;;  %v299_v8 = vadd.s32 4480, %v1202_v5  ;;  %v300_v10 = vadd.s32 4608, %v1202_v5 }
  0x42   : > { %v301_v11 = vadd.s32 4736, %v1202_v5  ;;  %v302_v12 = vadd.s32 4864, %v1202_v5  ;;  %v303_v13 = vadd.s32 4992, %v1202_v5  ;;  %v304_v14 = vadd.s32 5120, %v1202_v5 }
  0x43   : > { %371 = vperm.xlu0 %982, %v366_v3   ;;  %v305_v15 = vadd.s32 5248, %v1202_v5  ;;  %v306_v16 = vadd.s32 5376, %v1202_v5  ;;  %v307_v17 = vadd.s32 5504, %v1202_v5  ;;  %v308_v18 = vadd.s32 5632, %v1202_v5 }
  0x44   : > { %v309_v19 = vadd.s32 5760, %v1202_v5  ;;  %v310_v20 = vadd.s32 5888, %v1202_v5  ;;  %v311_v21 = vadd.s32 6016, %v1202_v5  ;;  %v312_v22 = vadd.s32 6144, %v1202_v5 }
  0x45   : > { %v313_v23 = vadd.s32 6272, %v1202_v5  ;;  %v1224_v24 = vadd.s32 %v1207_v9, %v297_v6  ;;  %v1227_v25 = vadd.s32 %v1207_v9, %v298_v7  ;;  %v1230_v26 = vadd.s32 %v1207_v9, %v299_v8 }
  0x46   : > { %v1233_v27 = vadd.s32 %v1207_v9, %v300_v10  ;;  %v1236_v28 = vadd.s32 %v1207_v9, %v301_v11  ;;  %v1239_v29 = vadd.s32 %v1207_v9, %v302_v12  ;;  %v1242_v30 = vadd.s32 %v1207_v9, %v303_v13  ;;  %v478_v12 = vld [vmem:[%s1188_s8 + $0x28] sm:$0xff] }
  0x47   : > { %v1245_v31 = vadd.s32 %v1207_v9, %v304_v14  ;;  %v1248_v32 = vadd.s32 %v1207_v9, %v305_v15  ;;  %v1251_v33 = vadd.s32 %v1207_v9, %v306_v16  ;;  %v1254_v34 = vadd.s32 %v1207_v9, %v307_v17  ;;  %v479_v14 = vld [vmem:[%s1188_s8 + $0x30] sm:$0xff] }
  0x48   : > { %v1257_v35 = vadd.s32 %v1207_v9, %v308_v18  ;;  %v1260_v36 = vadd.s32 %v1207_v9, %v309_v19  ;;  %v1263_v37 = vadd.s32 %v1207_v9, %v310_v20  ;;  %v1266_v38 = vadd.s32 %v1207_v9, %v311_v21  ;;  %v480_v18 = vld [vmem:[%s1188_s8 + $0x38] sm:$0xff]  ;;  %v481_v19 = vld [vmem:[%s1188_s8 + $0x40] sm:$0xff] }
  0x49   : > { %v1269_v39 = vadd.s32 %v1207_v9, %v312_v22  ;;  %v1272_v40 = vadd.s32 %v1207_v9, %v313_v23  ;;  %v265_v42 = vadd.s32 128, %v1202_v5  ;;  %v266_v43 = vadd.s32 256, %v1202_v5 }
  0x4a   : > { %v1314_v44 = vadd.s32 %v1207_v9, %v1202_v5  ;;  %v267_v46 = vadd.s32 384, %v1202_v5  ;;  %v268_v47 = vadd.s32 512, %v1202_v5  ;;  %v269_v51 = vadd.s32 640, %v1202_v5 }
  0x4b   : > { %v1317_v45 = vadd.s32 %v1207_v9, %v265_v42  ;;  %v1322_v48 = vadd.s32 %v1207_v9, %v266_v43  ;;  %v270_v53 = vadd.s32 768, %v1202_v5  ;;  %v271_v56 = vadd.s32 896, %v1202_v5 }
  0x4c   : > { %v1332_v52 = vadd.s32 %v1207_v9, %v267_v46  ;;  %v272_v57 = vadd.s32 1024, %v1202_v5  ;;  %v1338_v58 = vadd.s32 %v1207_v9, %v268_v47  ;;  %v273_v60 = vadd.s32 1152, %v1202_v5 }
  0x4d   : > { %v1345_v61 = vadd.s32 %v1207_v9, %v269_v51  ;;  %v1351_v0 = vadd.s32 %v1207_v9, %v270_v53  ;;  %v1354_v2 = vadd.s32 %v1207_v9, %v271_v56  ;;  %v274_v7 = vadd.s32 1280, %v1202_v5  ;;  %v482_v53 = vld [vmem:[%s1188_s8 + $0x48] sm:$0xff]  ;;  %v483_v56 = vld [vmem:[%s1188_s8 + $0x50] sm:$0xff] }
  0x4e   : > { %v1357_v3 = vadd.s32 %v1207_v9, %v272_v57  ;;  %v275_v10 = vadd.s32 1408, %v1202_v5  ;;  %v1365_v11 = vadd.s32 %v1207_v9, %v273_v60  ;;  %v276_v17 = vadd.s32 1536, %v1202_v5 }
  0x4f   : > { %v277_v21 = vadd.s32 1664, %v1202_v5  ;;  %v278_v22 = vadd.s32 1792, %v1202_v5  ;;  %v1385_v23 = vadd.s32 %v1207_v9, %v274_v7  ;;  %v279_v60 = vadd.s32 1920, %v1202_v5 }
  0x50   : > { %v1391_v43 = vadd.s32 %v1207_v9, %v275_v10 }
  0x51   : > { %v1451_v7 = vadd.s32 %v1207_v9, %v278_v22 }
  0xbe   : > { %v1274_v41 = vpop.permute.xlu0 %368 }
  0xbf   : > { %vm406_vm1 = vcmp.eq.s32.totalorder %v1224_v24, %v1274_v41  ;;  %vm407_vm2 = vcmp.eq.s32.totalorder %v1227_v25, %v1274_v41  ;;  %vm408_vm3 = vcmp.eq.s32.totalorder %v1230_v26, %v1274_v41  ;;  %vm409_vm4 = vcmp.eq.s32.totalorder %v1233_v27, %v1274_v41 }
  0xc0   : > { %vm410_vm5 = vcmp.eq.s32.totalorder %v1236_v28, %v1274_v41  ;;  %vm411_vm6 = vcmp.eq.s32.totalorder %v1239_v29, %v1274_v41  ;;  %vm412_vm7 = vcmp.eq.s32.totalorder %v1242_v30, %v1274_v41  ;;  %vm373_vm10 = vcmp.eq.s32.totalorder %v1314_v44, %v1274_v41 }
  0xc1   : > { %vm374_vm0 = vcmp.eq.s32.totalorder %v1317_v45, %v1274_v41  ;;  %v573_v54 = vsel %vm373_vm10, %v473_v49, 0.0  ;;  %vm375_vm15 = vcmp.eq.s32.totalorder %v1322_v48, %v1274_v41  ;;  %vm376_vm10 = vcmp.eq.s32.totalorder %v1332_v52, %v1274_v41 }
  0xc2   : > { %v574_v55 = vsel %vm374_vm0, %v474_v50, 0.0  ;;  %v575_v1 = vsel %vm375_vm15, %v475_v59, 0.0  ;;  %vm377_vm0 = vcmp.eq.s32.totalorder %v1338_v58, %v1274_v41  ;;  %v576_v8 = vsel %vm376_vm10, %v476_v62, 0.0  ;;  %v1373_v16 = vpop.permute.xlu0 %371 }
  0xc3   : > { %v673_v63 = vadd.f32 %v574_v55, %v573_v54  ;;  %vm378_vm15 = vcmp.eq.s32.totalorder %v1345_v61, %v1274_v41  ;;  %vm379_vm14 = vcmp.eq.s32.totalorder %v1351_v0, %v1274_v41  ;;  %v577_v15 = vsel %vm377_vm0, %v477_v4, 0.0 }
  0xc4   : > { %vm380_vm10 = vcmp.eq.s32.totalorder %v1354_v2, %v1274_v41  ;;  %vm381_vm13 = vcmp.eq.s32.totalorder %v1357_v3, %v1274_v41  ;;  %v578_v42 = vsel %vm378_vm15, %v478_v12, 0.0  ;;  %vm382_vm0 = vcmp.eq.s32.totalorder %v1365_v11, %v1274_v41 }
  0xc5   : > { %v674_v6 = vadd.f32 %v673_v63, %v575_v1  ;;  %v579_v46 = vsel %vm379_vm14, %v479_v14, 0.0  ;;  %v580_v49 = vsel %vm380_vm10, %v480_v18, 0.0  ;;  %v581_v50 = vsel %vm381_vm13, %v481_v19, 0.0  ;;  %v484_v63 = vld [vmem:[%s1188_s8 + $0x58] sm:$0xff] }
  0xc6   : > { %vm456_vm12 = vcmp.eq.s32.totalorder %v1224_v24, %v1373_v16  ;;  %vm465_vm9 = vcmp.eq.s32.totalorder %v1251_v33, %v1373_v16  ;;  %v1432_v55 = vadd.s32 %v1207_v9, %v276_v17  ;;  %vm383_vm8 = vcmp.eq.s32.totalorder %v1385_v23, %v1274_v41 }
  0xc7   : > { %v675_v13 = vadd.f32 %v674_v6, %v576_v8  ;;  %v582_v59 = vsel %vm382_vm0, %v482_v53, 0.0  ;;  %v1444_v62 = vadd.s32 %v1207_v9, %v277_v21  ;;  %vm384_vm11 = vcmp.eq.s32.totalorder %v1391_v43, %v1274_v41  ;;  %v485_v8 = vld [vmem:[%s1188_s8 + $0x60] sm:$0xff]  ;;  %v487_v21 = vld [vmem:[%s1188_s8 + $0x70] sm:$0xff] }
  0xc8   : > { %v280_v4 = vadd.s32 2048, %v1202_v5  ;;  %v583_v6 = vsel %vm383_vm8, %v483_v56, 0.0  ;;  %vm385_vm0 = vcmp.eq.s32.totalorder %v1432_v55, %v1274_v41  ;;  %v584_v12 = vsel %vm384_vm11, %v484_v63, 0.0  ;;  %v525_v63 = vld [vmem:[%s1188_s8 + $0x1a0] sm:$0xff] }
  0xc9   : > { %v676_v20 = vadd.f32 %v675_v13, %v577_v15  ;;  %v281_v13 = vadd.s32 2176, %v1202_v5  ;;  %v1458_v14 = vadd.s32 %v1207_v9, %v279_v60  ;;  %vm386_vm14 = vcmp.eq.s32.totalorder %v1444_v62, %v1274_v41  ;;  %v486_v15 = vld [vmem:[%s1188_s8 + $0x68] sm:$0xff] }
  0xca   : > { %v282_v18 = vadd.s32 2304, %v1202_v5  ;;  %v1465_v19 = vadd.s32 %v1207_v9, %v280_v4  ;;  %vm387_vm8 = vcmp.eq.s32.totalorder %v1451_v7, %v1274_v41  ;;  %vm423_vm11 = vcmp.eq.s32.totalorder %v1314_v44, %v1373_v16 }
  0xcb   : > { %v677_v47 = vadd.f32 %v676_v20, %v578_v42  ;;  %v585_v20 = vsel %vm385_vm0, %v485_v8, 0.0  ;;  %vm424_vm15 = vcmp.eq.s32.totalorder %v1317_v45, %v1373_v16  ;;  %v523_v42 = vld [vmem:[%s1188_s8 + $0x190] sm:$0xff]  ;;  %vm388_vm0 = vcmp.eq.s32.totalorder %v1458_v14, %v1274_v41  ;;  %v490_v8 = vld [vmem:[%s1188_s8 + $0x88] sm:$0xff] }
  0xcc   : > { %v284_v44 = vadd.s32 2560, %v1202_v5  ;;  %v623_v45 = vsel %vm423_vm11, %v523_v42, 0.0  ;;  %vm425_vm10 = vcmp.eq.s32.totalorder %v1322_v48, %v1373_v16  ;;  %v286_v48 = vadd.s32 2816, %v1202_v5 }
  0xcd   : > { %v678_v51 = vadd.f32 %v677_v47, %v579_v46  ;;  %v524_v46 = vld [vmem:[%s1188_s8 + $0x198] sm:$0xff]  ;;  %v283_v47 = vadd.s32 2432, %v1202_v5 }
  0xce   : > { %v624_v56 = vsel %vm424_vm15, %v524_v46, 0.0  ;;  %v287_v46 = vadd.s32 2944, %v1202_v5 }
  0xcf   : > { %v679_v54 = vadd.f32 %v678_v51, %v580_v49  ;;  %v586_v49 = vsel %vm386_vm14, %v486_v15, 0.0  ;;  %v488_v51 = vld [vmem:[%s1188_s8 + $0x78] sm:$0xff]  ;;  %vm389_vm14 = vcmp.eq.s32.totalorder %v1465_v19, %v1274_v41  ;;  %v1495_v4 = vadd.s32 %v1207_v9, %v283_v47 }
  0xd0   : > { %v1505_v15 = vadd.s32 %v1207_v9, %v284_v44 }
  0xd1   : > { %v680_v57 = vadd.f32 %v679_v54, %v581_v50  ;;  %v1478_v50 = vadd.s32 %v1207_v9, %v281_v13  ;;  %v587_v54 = vsel %vm387_vm8, %v487_v21, 0.0  ;;  %vm426_vm8 = vcmp.eq.s32.totalorder %v1332_v52, %v1373_v16 }
  0xd2   : > { %v724_v13 = vadd.f32 %v624_v56, %v623_v45  ;;  %v288_v56 = vadd.s32 3072, %v1202_v5 }
  0xd3   : > { %v681_v1 = vadd.f32 %v680_v57, %v582_v59  ;;  %v1485_v57 = vadd.s32 %v1207_v9, %v282_v18  ;;  %v489_v59 = vld [vmem:[%s1188_s8 + $0x80] sm:$0xff]  ;;  %vm390_vm15 = vcmp.eq.s32.totalorder %v1478_v50, %v1274_v41  ;;  %v625_v18 = vsel %vm425_vm10, %v525_v63, 0.0 }
  0xd4   : > { %v725_v42 = vadd.f32 %v724_v13, %v625_v18  ;;  %vm392_vm10 = vcmp.eq.s32.totalorder %v1495_v4, %v1274_v41  ;;  %v493_v63 = vld [vmem:[%s1188_s8 + $0xa0] sm:$0xff]  ;;  %v530_v18 = vld [vmem:[%s1188_s8 + $0x1c8] sm:$0xff] }
  0xd5   : > { %v682_v10 = vadd.f32 %v681_v1, %v583_v6  ;;  %v285_v1 = vadd.s32 2688, %v1202_v5  ;;  %v588_v6 = vsel %vm388_vm0, %v488_v51, 0.0  ;;  %vm391_vm11 = vcmp.eq.s32.totalorder %v1485_v57, %v1274_v41 }
  0xd6   : > { %vm427_vm0 = vcmp.eq.s32.totalorder %v1338_v58, %v1373_v16 }
  0xd7   : > { %v683_v17 = vadd.f32 %v682_v10, %v584_v12  ;;  %v526_v12 = vld [vmem:[%s1188_s8 + $0x1a8] sm:$0xff]  ;;  %v1518_v47 = vadd.s32 %v1207_v9, %v285_v1 }
  0xd8   : > { %v626_v51 = vsel %vm426_vm8, %v526_v12, 0.0  ;;  %vm429_vm8 = vcmp.eq.s32.totalorder %v1351_v0, %v1373_v16  ;;  %v1550_v12 = vadd.s32 %v1207_v9, %v287_v46  ;;  %v495_v46 = vld [vmem:[%s1188_s8 + $0xb0] sm:$0xff] }
  0xd9   : > { %v684_v22 = vadd.f32 %v683_v17, %v585_v20  ;;  %v589_v17 = vsel %vm389_vm14, %v489_v59, 0.0  ;;  %v491_v20 = vld [vmem:[%s1188_s8 + $0x90] sm:$0xff]  ;;  %vm428_vm14 = vcmp.eq.s32.totalorder %v1345_v61, %v1373_v16  ;;  %v726_v45 = vadd.f32 %v725_v42, %v626_v51 }
  0xda   : > { %v1534_v59 = vadd.s32 %v1207_v9, %v286_v48  ;;  %v591_v52 = vsel %vm391_vm11, %v491_v20, 0.0  ;;  %vm394_vm11 = vcmp.eq.s32.totalorder %v1518_v47, %v1274_v41  ;;  %v494_v48 = vld [vmem:[%s1188_s8 + $0xa8] sm:$0xff]  ;;  %v531_v51 = vld [vmem:[%s1188_s8 + $0x1d0] sm:$0xff] }
  0xdb   : > { %v685_v53 = vadd.f32 %v684_v22, %v586_v49  ;;  %v527_v22 = vld [vmem:[%s1188_s8 + $0x1b0] sm:$0xff]  ;;  %v590_v49 = vsel %vm390_vm15, %v490_v8, 0.0  ;;  %vm393_vm15 = vcmp.eq.s32.totalorder %v1505_v15, %v1274_v41  ;;  %v594_v0 = vsel %vm394_vm11, %v494_v48, 0.0 }
  0xdc   : > { %v593_v61 = vsel %vm393_vm15, %v493_v63, 0.0  ;;  %vm396_vm15 = vcmp.eq.s32.totalorder %v1550_v12, %v1274_v41 }
  0xdd   : > { %v686_v60 = vadd.f32 %v685_v53, %v587_v54  ;;  %v492_v53 = vld [vmem:[%s1188_s8 + $0x98] sm:$0xff] }
  0xde   : > { %v528_v54 = vld [vmem:[%s1188_s8 + $0x1b8] sm:$0xff]  ;;  %v592_v58 = vsel %vm392_vm10, %v492_v53, 0.0  ;;  %vm395_vm10 = vcmp.eq.s32.totalorder %v1534_v59, %v1274_v41 }
  0xdf   : > { %v687_v10 = vadd.f32 %v686_v60, %v588_v6  ;;  %v627_v60 = vsel %vm427_vm0, %v527_v22, 0.0  ;;  %v529_v6 = vld [vmem:[%s1188_s8 + $0x1c0] sm:$0xff]  ;;  %v628_v13 = vsel %vm428_vm14, %v528_v54, 0.0  ;;  %vm430_vm0 = vcmp.eq.s32.totalorder %v1354_v2, %v1373_v16 }
  0xe0   : > { %v727_v8 = vadd.f32 %v726_v45, %v627_v60  ;;  %v1566_v22 = vadd.s32 %v1207_v9, %v288_v56  ;;  %v629_v42 = vsel %vm429_vm8, %v529_v6, 0.0  ;;  %vm431_vm14 = vcmp.eq.s32.totalorder %v1357_v3, %v1373_v16  ;;  %v496_v56 = vld [vmem:[%s1188_s8 + $0xb8] sm:$0xff] }
  0xe1   : > { %v688_v21 = vadd.f32 %v687_v10, %v589_v17  ;;  %v289_v10 = vadd.s32 3200, %v1202_v5  ;;  %v630_v45 = vsel %vm430_vm0, %v530_v18, 0.0  ;;  %vm432_vm8 = vcmp.eq.s32.totalorder %v1365_v11, %v1373_v16  ;;  %v532_v60 = vld [vmem:[%s1188_s8 + $0x1d8] sm:$0xff] }
  0xe2   : > { %v728_v20 = vadd.f32 %v727_v8, %v628_v13  ;;  %v595_v2 = vsel %vm395_vm10, %v495_v46, 0.0  ;;  %v631_v8 = vsel %vm431_vm14, %v531_v51, 0.0  ;;  %vm397_vm11 = vcmp.eq.s32.totalorder %v1566_v22, %v1274_v41  ;;  %v533_v13 = vld [vmem:[%s1188_s8 + $0x1e0] sm:$0xff] }
  0xe3   : > { %v689_v44 = vadd.f32 %v688_v21, %v590_v49  ;;  %v290_v21 = vadd.s32 3328, %v1202_v5  ;;  %v1582_v54 = vadd.s32 %v1207_v9, %v289_v10  ;;  %v497_v10 = vld [vmem:[%s1188_s8 + $0xc0] sm:$0xff]  ;;  %vm433_vm0 = vcmp.eq.s32.totalorder %v1385_v23, %v1373_v16 }
  0xe4   : > { %v729_v53 = vadd.f32 %v728_v20, %v629_v42  ;;  %v596_v3 = vsel %vm396_vm15, %v496_v56, 0.0  ;;  %v632_v20 = vsel %vm432_vm8, %v532_v60, 0.0  ;;  %vm434_vm14 = vcmp.eq.s32.totalorder %v1391_v43, %v1373_v16  ;;  %v534_v42 = vld [vmem:[%s1188_s8 + $0x1e8] sm:$0xff] }
  0xe5   : > { %v690_v1 = vadd.f32 %v689_v44, %v591_v52  ;;  %v291_v44 = vadd.s32 3456, %v1202_v5  ;;  %v1598_v6 = vadd.s32 %v1207_v9, %v290_v21  ;;  %vm398_vm10 = vcmp.eq.s32.totalorder %v1582_v54, %v1274_v41  ;;  %v498_v21 = vld [vmem:[%s1188_s8 + $0xc8] sm:$0xff] }
  0xe6   : > { %v730_v63 = vadd.f32 %v729_v53, %v630_v45  ;;  %v597_v11 = vsel %vm397_vm11, %v497_v10, 0.0  ;;  %v633_v53 = vsel %vm433_vm0, %v533_v13, 0.0  ;;  %vm435_vm8 = vcmp.eq.s32.totalorder %v1432_v55, %v1373_v16  ;;  %v535_v45 = vld [vmem:[%s1188_s8 + $0x1f0] sm:$0xff] }
  0xe7   : > { %v691_v17 = vadd.f32 %v690_v1, %v592_v58  ;;  %v292_v1 = vadd.s32 3584, %v1202_v5  ;;  %v1614_v18 = vadd.s32 %v1207_v9, %v291_v44  ;;  %vm399_vm15 = vcmp.eq.s32.totalorder %v1598_v6, %v1274_v41  ;;  %v499_v44 = vld [vmem:[%s1188_s8 + $0xd0] sm:$0xff] }
  0xe8   : > { %v731_v48 = vadd.f32 %v730_v63, %v631_v8  ;;  %v598_v23 = vsel %vm398_vm10, %v498_v21, 0.0  ;;  %v634_v63 = vsel %vm434_vm14, %v534_v42, 0.0  ;;  %vm436_vm0 = vcmp.eq.s32.totalorder %v1444_v62, %v1373_v16  ;;  %v536_v8 = vld [vmem:[%s1188_s8 + $0x1f8] sm:$0xff]  ;;  %v501_v62 = vld [vmem:[%s1188_s8 + $0xe0] sm:$0xff] }
  0xe9   : > { %v692_v49 = vadd.f32 %v691_v17, %v593_v61  ;;  %v293_v17 = vadd.s32 3712, %v1202_v5  ;;  %v1630_v51 = vadd.s32 %v1207_v9, %v292_v1  ;;  %vm400_vm11 = vcmp.eq.s32.totalorder %v1614_v18, %v1274_v41  ;;  %v500_v1 = vld [vmem:[%s1188_s8 + $0xd8] sm:$0xff] }
  0xea   : > { %v732_v46 = vadd.f32 %v731_v48, %v632_v20  ;;  %v599_v43 = vsel %vm399_vm15, %v499_v44, 0.0  ;;  %v635_v48 = vsel %vm435_vm8, %v535_v45, 0.0  ;;  %vm437_vm14 = vcmp.eq.s32.totalorder %v1451_v7, %v1373_v16  ;;  %v538_v7 = vld [vmem:[%s1188_s8 + $0x208] sm:$0xff]  ;;  %v503_v44 = vld [vmem:[%s1188_s8 + $0xf0] sm:$0xff] }
  0xeb   : > { %v693_v52 = vadd.f32 %v692_v49, %v594_v0  ;;  %v294_v49 = vadd.s32 3840, %v1202_v5  ;;  %v1646_v60 = vadd.s32 %v1207_v9, %v293_v17  ;;  %vm401_vm10 = vcmp.eq.s32.totalorder %v1630_v51, %v1274_v41 }
  0xec   : > { %v733_v56 = vadd.f32 %v732_v46, %v633_v53  ;;  %v600_v55 = vsel %vm400_vm11, %v500_v1, 0.0  ;;  %v636_v21 = vsel %vm436_vm0, %v536_v8, 0.0  ;;  %vm438_vm8 = vcmp.eq.s32.totalorder %v1458_v14, %v1373_v16  ;;  %v539_v14 = vld [vmem:[%s1188_s8 + $0x210] sm:$0xff] }
  0xed   : > { %v694_v58 = vadd.f32 %v693_v52, %v595_v2  ;;  %v295_v52 = vadd.s32 3968, %v1202_v5  ;;  %v1662_v13 = vadd.s32 %v1207_v9, %v294_v49  ;;  %vm402_vm15 = vcmp.eq.s32.totalorder %v1646_v60, %v1274_v41 }
  0xee   : > { %v734_v10 = vadd.f32 %v733_v56, %v634_v63  ;;  %vm439_vm0 = vcmp.eq.s32.totalorder %v1465_v19, %v1373_v16  ;;  %v540_v63 = vld [vmem:[%s1188_s8 + $0x218] sm:$0xff]  ;;  %v505_v19 = vld [vmem:[%s1188_s8 + $0x100] sm:$0xff] }
  0xef   : > { %v695_v61 = vadd.f32 %v694_v58, %v596_v3  ;;  %v296_v58 = vadd.s32 4096, %v1202_v5  ;;  %v537_v5 = vld [vmem:[%s1188_s8 + $0x200] sm:$0xff]  ;;  %v1677_v20 = vadd.s32 %v1207_v9, %v295_v52  ;;  %vm403_vm11 = vcmp.eq.s32.totalorder %v1662_v13, %v1274_v41  ;;  %v504_v52 = vld [vmem:[%s1188_s8 + $0xf8] sm:$0xff] }
  0xf0   : > { %v735_v3 = vadd.f32 %v734_v10, %v635_v48  ;;  %v637_v53 = vsel %vm437_vm14, %v537_v5, 0.0  ;;  %v639_v8 = vsel %vm439_vm0, %v539_v14, 0.0  ;;  %v542_v5 = vld [vmem:[%s1188_s8 + $0x228] sm:$0xff]  ;;  %vm1932_vm0 = vcmp.eq.s32.totalorder %v1245_v31, %v1274_v41 }
  0xf1   : > { %v696_v0 = vadd.f32 %v695_v61, %v597_v11  ;;  %v502_v61 = vld [vmem:[%s1188_s8 + $0xe8] sm:$0xff]  ;;  %v1689_v49 = vadd.s32 %v1207_v9, %v296_v58  ;;  %v601_v11 = vsel %vm401_vm10, %v501_v62, 0.0  ;;  %v638_v9 = vsel %vm438_vm8, %v538_v7, 0.0  ;;  %v541_v58 = vld [vmem:[%s1188_s8 + $0x220] sm:$0xff] }
  0xf2   : > { %v736_v46 = vadd.f32 %v735_v3, %v636_v21  ;;  %v602_v56 = vsel %vm402_vm15, %v502_v61, 0.0  ;;  %vm404_vm13 = vcmp.eq.s32.totalorder %v1677_v20, %v1274_v41  ;;  %vm440_vm10 = vcmp.eq.s32.totalorder %v1478_v50, %v1373_v16  ;;  %v506_v62 = vld [vmem:[%s1188_s8 + $0x108] sm:$0xff]  ;;  %v507_v61 = vld [vmem:[%s1188_s8 + $0x110] sm:$0xff] }
  0xf3   : > { %v697_v2 = vadd.f32 %v696_v0, %v598_v23  ;;  %vm405_vm14 = vcmp.eq.s32.totalorder %v1689_v49, %v1274_v41  ;;  %vm441_vm15 = vcmp.eq.s32.totalorder %v1485_v57, %v1373_v16  ;;  %v604_v48 = vsel %vm404_vm13, %v504_v52, 0.0  ;;  %v543_v57 = vld [vmem:[%s1188_s8 + $0x230] sm:$0xff] }
  0xf4   : > { %v737_v45 = vadd.f32 %v736_v46, %v637_v53  ;;  %v640_v50 = vsel %vm440_vm10, %v540_v63, 0.0  ;;  %vm442_vm8 = vcmp.eq.s32.totalorder %v1495_v4, %v1373_v16  ;;  %v641_v21 = vsel %vm441_vm15, %v541_v58, 0.0  ;;  %v508_v4 = vld [vmem:[%s1188_s8 + $0x118] sm:$0xff]  ;;  %v510_v63 = vld [vmem:[%s1188_s8 + $0x128] sm:$0xff] }
  0xf5   : > { %v698_v17 = vadd.f32 %v697_v2, %v599_v43  ;;  %v603_v2 = vsel %vm403_vm11, %v503_v44, 0.0  ;;  %vm443_vm11 = vcmp.eq.s32.totalorder %v1505_v15, %v1373_v16  ;;  %v606_v46 = vsel %vm406_vm1, %v506_v62, 0.0  ;;  %v544_v44 = vld [vmem:[%s1188_s8 + $0x238] sm:$0xff] }
  0xf6   : > { %v738_v1 = vadd.f32 %v737_v45, %v638_v9  ;;  %vm444_vm13 = vcmp.eq.s32.totalorder %v1518_v47, %v1373_v16  ;;  %v607_v15 = vsel %vm407_vm2, %v507_v61, 0.0  ;;  %v643_v14 = vsel %vm443_vm11, %v543_v57, 0.0  ;;  %v509_v45 = vld [vmem:[%s1188_s8 + $0x120] sm:$0xff]  ;;  %v512_v62 = vld [vmem:[%s1188_s8 + $0x138] sm:$0xff] }
  0xf7   : > { %v699_v42 = vadd.f32 %v698_v17, %v600_v55  ;;  %v605_v55 = vsel %vm405_vm14, %v505_v19, 0.0  ;;  %vm445_vm1 = vcmp.eq.s32.totalorder %v1534_v59, %v1373_v16  ;;  %v545_v9 = vld [vmem:[%s1188_s8 + $0x240] sm:$0xff]  ;;  %v608_v47 = vsel %vm408_vm3, %v508_v4, 0.0  ;;  %v550_v4 = vld [vmem:[%s1188_s8 + $0x268] sm:$0xff] }
  0xf8   : > { %v739_v43 = vadd.f32 %v738_v1, %v639_v8  ;;  %vm446_vm2 = vcmp.eq.s32.totalorder %v1550_v12, %v1373_v16  ;;  %v609_v59 = vsel %vm409_vm4, %v509_v45, 0.0  ;;  %v645_v19 = vsel %vm445_vm1, %v545_v9, 0.0  ;;  %v516_v9 = vld [vmem:[%s1188_s8 + $0x158] sm:$0xff] }
  0xf9   : > { %v700_v0 = vadd.f32 %v699_v42, %v601_v11  ;;  %v642_v11 = vsel %vm442_vm8, %v542_v5, 0.0  ;;  %vm447_vm3 = vcmp.eq.s32.totalorder %v1566_v22, %v1373_v16  ;;  %v610_v12 = vsel %vm410_vm5, %v510_v63, 0.0  ;;  %v548_v5 = vld [vmem:[%s1188_s8 + $0x258] sm:$0xff] }
  0xfa   : > { %v740_v3 = vadd.f32 %v739_v43, %v640_v50  ;;  %v547_v43 = vld [vmem:[%s1188_s8 + $0x250] sm:$0xff]  ;;  %vm448_vm4 = vcmp.eq.s32.totalorder %v1582_v54, %v1373_v16  ;;  %vm449_vm5 = vcmp.eq.s32.totalorder %v1598_v6, %v1373_v16  ;;  %v612_v54 = vsel %vm412_vm7, %v512_v62, 0.0 }
  0xfb   : > { %v701_v23 = vadd.f32 %v700_v0, %v602_v56  ;;  %vm451_vm7 = vcmp.eq.s32.totalorder %v1630_v51, %v1373_v16  ;;  %vm1933_vm10 = vcmp.eq.s32.totalorder %v1248_v32, %v1274_v41  ;;  %vm452_vm14 = vcmp.eq.s32.totalorder %v1646_v60, %v1373_v16 }
  0xfc   : > { %v741_v7 = vadd.f32 %v740_v3, %v641_v21  ;;  %v513_v21 = vld [vmem:[%s1188_s8 + $0x140] sm:$0xff]  ;;  %vm1934_vm15 = vcmp.eq.s32.totalorder %v1251_v33, %v1274_v41  ;;  %vm453_vm8 = vcmp.eq.s32.totalorder %v1662_v13, %v1373_v16  ;;  %vm1935_vm11 = vcmp.eq.s32.totalorder %v1254_v34, %v1274_v41 }
  0xfd   : > { %v702_v10 = vadd.f32 %v701_v23, %v603_v2  ;;  %v644_v23 = vsel %vm444_vm13, %v544_v44, 0.0  ;;  %v546_v2 = vld [vmem:[%s1188_s8 + $0x248] sm:$0xff]  ;;  %v613_v6 = vsel %vm1932_vm0, %v513_v21, 0.0  ;;  %v616_v60 = vsel %vm1935_vm11, %v516_v9, 0.0  ;;  %v556_v21 = vld [vmem:[%s1188_s8 + $0x298] sm:$0xff] }
  0xfe   : > { %v742_v0 = vadd.f32 %v741_v7, %v642_v11  ;;  %v646_v50 = vsel %vm446_vm2, %v546_v2, 0.0  ;;  %v648_v7 = vsel %vm448_vm4, %v548_v5, 0.0  ;;  %vm454_vm13 = vcmp.eq.s32.totalorder %v1677_v20, %v1373_v16 }
  0xff   : > { %v703_v17 = vadd.f32 %v702_v10, %v604_v48  ;;  %v511_v10 = vld [vmem:[%s1188_s8 + $0x130] sm:$0xff]  ;;  %vm1936_vm1 = vcmp.eq.s32.totalorder %v1257_v35, %v1274_v41  ;;  %vm455_vm2 = vcmp.eq.s32.totalorder %v1689_v49, %v1373_v16  ;;  %vm1938_vm4 = vcmp.eq.s32.totalorder %v1263_v37, %v1274_v41  ;;  %v521_v49 = vld [vmem:[%s1188_s8 + $0x180] sm:$0xff] }
 0x100   : > { %v743_v52 = vadd.f32 %v742_v0, %v643_v14  ;;  %v611_v22 = vsel %vm411_vm6, %v511_v10, 0.0  ;;  %vm450_vm6 = vcmp.eq.s32.totalorder %v1614_v18, %v1373_v16  ;;  %v515_v0 = vld [vmem:[%s1188_s8 + $0x150] sm:$0xff]  ;;  %v518_v10 = vld [vmem:[%s1188_s8 + $0x168] sm:$0xff]  ;;  %vm1941_vm0 = vcmp.eq.s32.totalorder %v1227_v25, %v1373_v16 }
 0x101   : > { %v704_v42 = vadd.f32 %v703_v17, %v605_v55  ;;  %v647_v55 = vsel %vm447_vm3, %v547_v43, 0.0  ;;  %v551_v14 = vld [vmem:[%s1188_s8 + $0x270] sm:$0xff]  ;;  %v615_v51 = vsel %vm1934_vm15, %v515_v0, 0.0  ;;  %v554_v43 = vld [vmem:[%s1188_s8 + $0x288] sm:$0xff]  ;;  %vm1937_vm3 = vcmp.eq.s32.totalorder %v1260_v36, %v1274_v41 }
 0x102   : > { %v744_v8 = vadd.f32 %v743_v52, %v644_v23  ;;  %v651_v63 = vsel %vm451_vm7, %v551_v14, 0.0  ;;  %v618_v20 = vsel %vm1937_vm3, %v518_v10, 0.0  ;;  %vm1943_vm7 = vcmp.eq.s32.totalorder %v1230_v26, %v1373_v16  ;;  %v562_v26 = vld [vmem:[%s1188_s8 + $0x2c8] sm:$0xff]  ;;  %v565_v10 = vld [vmem:[%s1188_s8 + $0x2e0] sm:$0xff] }
 0x103   : > { %v705_v53 = vadd.f32 %v704_v42, %v606_v46  ;;  %v549_v42 = vld [vmem:[%s1188_s8 + $0x260] sm:$0xff]  ;;  %v514_v46 = vld [vmem:[%s1188_s8 + $0x148] sm:$0xff]  ;;  %vm1946_vm15 = vcmp.eq.s32.totalorder %v1239_v29, %v1373_v16  ;;  %vm1948_vm11 = vcmp.eq.s32.totalorder %v1245_v31, %v1373_v16  ;;  %vm1952_vm3 = vcmp.eq.s32.totalorder %v1260_v36, %v1373_v16 }
 0x104   : > { %v745_v48 = vadd.f32 %v744_v8, %v645_v19  ;;  %v649_v44 = vsel %vm449_vm5, %v549_v42, 0.0  ;;  %v614_v18 = vsel %vm1933_vm10, %v514_v46, 0.0  ;;  %v553_v8 = vld [vmem:[%s1188_s8 + $0x280] sm:$0xff]  ;;  %vm1939_vm5 = vcmp.eq.s32.totalorder %v1266_v38, %v1274_v41 }
 0x105   : > { %v706_v56 = vadd.f32 %v705_v53, %v607_v15  ;;  %vm1944_vm10 = vcmp.eq.s32.totalorder %v1233_v27, %v1373_v16 }
 0x106   : > { %v746_v3 = vadd.f32 %v745_v48, %v646_v50  ;;  %v519_v50 = vld [vmem:[%s1188_s8 + $0x170] sm:$0xff] }
 0x107   : > { %v707_v1 = vadd.f32 %v706_v56, %v608_v47  ;;  %v650_v56 = vsel %vm450_vm6, %v550_v4, 0.0  ;;  %v552_v47 = vld [vmem:[%s1188_s8 + $0x278] sm:$0xff]  ;;  %v619_v42 = vsel %vm1938_vm4, %v519_v50, 0.0  ;;  %v656_v4 = vsel %vm456_vm12, %v556_v21, 0.0 }
 0x108   : > { %v747_v57 = vadd.f32 %v746_v3, %v647_v55  ;;  %v652_v19 = vsel %vm452_vm14, %v552_v47, 0.0  ;;  %v654_v3 = vsel %vm454_vm13, %v554_v43, 0.0  ;;  %vm1940_vm6 = vcmp.eq.s32.totalorder %v1269_v39, %v1274_v41  ;;  %v560_v47 = vld [vmem:[%s1188_s8 + $0x2b8] sm:$0xff]  ;;  %v566_v43 = vld [vmem:[%s1188_s8 + $0x2e8] sm:$0xff] }
 0x109   : > { %v708_v58 = vadd.f32 %v707_v1, %v609_v59  ;;  %v517_v1 = vld [vmem:[%s1188_s8 + $0x160] sm:$0xff]  ;;  %vm1942_vm12 = vcmp.eq.s32.totalorder %v1272_v40, %v1274_v41  ;;  %vm1945_vm14 = vcmp.eq.s32.totalorder %v1236_v28, %v1373_v16  ;;  %vm1949_vm13 = vcmp.eq.s32.totalorder %v1248_v32, %v1373_v16  ;;  %v568_v50 = vld [vmem:[%s1188_s8 + $0x2f8] sm:$0xff] }
 0x10a   : > { %v748_v53 = vadd.f32 %v747_v57, %v648_v7  ;;  %v617_v13 = vsel %vm1936_vm1, %v517_v1, 0.0  ;;  %v557_v7 = vld [vmem:[%s1188_s8 + $0x2a0] sm:$0xff]  ;;  %v660_v41 = vsel %vm1945_vm14, %v560_v47, 0.0  ;;  %vm1950_vm1 = vcmp.eq.s32.totalorder %v1254_v34, %v1373_v16  ;;  %v571_v34 = vld [vmem:[%s1188_s8 + $0x310] sm:$0xff] }
 0x10b   : > { %v709_v17 = vadd.f32 %v708_v58, %v610_v12  ;;  %v653_v12 = vsel %vm453_vm8, %v553_v8, 0.0  ;;  %v657_v14 = vsel %vm1941_vm0, %v557_v7, 0.0  ;;  %v563_v8 = vld [vmem:[%s1188_s8 + $0x2d0] sm:$0xff]  ;;  %vm1947_vm8 = vcmp.eq.s32.totalorder %v1242_v30, %v1373_v16 }
 0x10c   : > { %v749_v45 = vadd.f32 %v748_v53, %v649_v44  ;;  %v522_v53 = vld [vmem:[%s1188_s8 + $0x188] sm:$0xff]  ;;  %v662_v27 = vsel %vm1947_vm8, %v562_v26, 0.0  ;;  %v663_v28 = vsel %vm1948_vm11, %v563_v8, 0.0  ;;  %v665_v30 = vsel %vm465_vm9, %v565_v10, 0.0 }
 0x10d   : > { %v710_v61 = vadd.f32 %v709_v17, %v611_v22  ;;  %v555_v17 = vld [vmem:[%s1188_s8 + $0x290] sm:$0xff]  ;;  %v520_v22 = vld [vmem:[%s1188_s8 + $0x178] sm:$0xff]  ;;  %v558_v44 = vld [vmem:[%s1188_s8 + $0x2a8] sm:$0xff]  ;;  %v622_v24 = vsel %vm1942_vm12, %v522_v53, 0.0  ;;  %v666_v31 = vsel %vm1950_vm1, %v566_v43, 0.0  ;;  %v668_v33 = vsel %vm1952_vm3, %v568_v50, 0.0 }
 0x10e   : > { %v750_v23 = vadd.f32 %v749_v45, %v650_v56  ;;  %v655_v57 = vsel %vm455_vm2, %v555_v17, 0.0  ;;  %v658_v9 = vsel %vm1943_vm7, %v558_v44, 0.0  ;;  %vm1951_vm2 = vcmp.eq.s32.totalorder %v1257_v35, %v1373_v16  ;;  %v569_v17 = vld [vmem:[%s1188_s8 + $0x300] sm:$0xff]  ;;  %v572_v35 = vld [vmem:[%s1188_s8 + $0x318] sm:$0xff] }
 0x10f   : > { %v711_v11 = vadd.f32 %v710_v61, %v612_v54  ;;  %vm1953_vm9 = vcmp.eq.s32.totalorder %v1263_v37, %v1373_v16  ;;  %vm1954_vm4 = vcmp.eq.s32.totalorder %v1266_v38, %v1373_v16  ;;  %v775_v37 = vld [vmem:[#allocation2] sm:$0xff]  ;;  %vm779_vm0 = vcmask 7168   ;;  %v776_v38 = vld [vmem:[#allocation2 + $0x8] sm:$0xff] }
 0x110   : > { %v751_v59 = vadd.f32 %v750_v23, %v651_v63 }
 0x111   : > { %v712_v15 = vadd.f32 %v711_v11, %v613_v6  ;;  %v620_v11 = vsel %vm1939_vm5, %v520_v22, 0.0  ;;  %v669_v22 = vsel %vm1953_vm9, %v569_v17, 0.0  ;;  %vm1955_vm5 = vcmp.eq.s32.totalorder %v1269_v39, %v1373_v16 }
 0x112   : > { %v752_v48 = vadd.f32 %v751_v59, %v652_v19 }
 0x113   : > { %v713_v52 = vadd.f32 %v712_v15, %v614_v18  ;;  %v621_v15 = vsel %vm1940_vm6, %v521_v49, 0.0  ;;  %v559_v18 = vld [vmem:[%s1188_s8 + $0x2b0] sm:$0xff]  ;;  %vm1956_vm6 = vcmp.eq.s32.totalorder %v1272_v40, %v1373_v16 }
 0x114   : > { %v753_v5 = vadd.f32 %v752_v48, %v653_v12  ;;  %v659_v25 = vsel %vm1944_vm10, %v559_v18, 0.0 }
 0x115   : > { %v714_v2 = vadd.f32 %v713_v52, %v615_v51  ;;  %v561_v51 = vld [vmem:[%s1188_s8 + $0x2c0] sm:$0xff] }
 0x116   : > { %v754_v61 = vadd.f32 %v753_v5, %v654_v3 }
 0x117   : > { %v715_v58 = vadd.f32 %v714_v2, %v616_v60  ;;  %v661_v2 = vsel %vm1946_vm15, %v561_v51, 0.0  ;;  %v564_v60 = vld [vmem:[%s1188_s8 + $0x2d8] sm:$0xff] }
 0x118   : > { %v755_v46 = vadd.f32 %v754_v61, %v655_v57  ;;  %v664_v29 = vsel %vm1949_vm13, %v564_v60, 0.0  ;;  %v672_v57 = vsel %vm1956_vm6, %v572_v35, 0.0 }
 0x119   : > { %v716_v62 = vadd.f32 %v715_v58, %v617_v13  ;;  %v567_v13 = vld [vmem:[%s1188_s8 + $0x2f0] sm:$0xff] }
 0x11a   : > { %v756_v0 = vadd.f32 %v755_v46, %v656_v4  ;;  %v667_v32 = vsel %vm1951_vm2, %v567_v13, 0.0 }
 0x11b   : > { %v717_v55 = vadd.f32 %v716_v62, %v618_v20  ;;  %v570_v20 = vld [vmem:[%s1188_s8 + $0x308] sm:$0xff] }
 0x11c   : > { %v757_v56 = vadd.f32 %v756_v0, %v657_v14  ;;  %v670_v21 = vsel %vm1954_vm4, %v570_v20, 0.0 }
 0x11d   : > { %v718_v54 = vadd.f32 %v717_v55, %v619_v42  ;;  %v671_v42 = vsel %vm1955_vm5, %v571_v34, 0.0 }
 0x11e   : > { %v758_v23 = vadd.f32 %v757_v56, %v658_v9 }
 0x11f   : > { %v719_v6 = vadd.f32 %v718_v54, %v620_v11 }
 0x120   : > { %v759_v63 = vadd.f32 %v758_v23, %v659_v25 }
 0x121   : > { %v720_v45 = vadd.f32 %v719_v6, %v621_v15  ;;  %v794_v6 = vld [vmem:[%s1927_s2] sm:$0xff] (!%p914_p7)  ;;  %v795_v15 = vld [vmem:[%s1927_s2 + $0x8] sm:$0xff] (!%p914_p7) }
 0x122   : > { %v760_v1 = vadd.f32 %v759_v63, %v660_v41 }
 0x123   : > { %v721_v52 = vadd.f32 %v720_v45, %v622_v24 }
 0x124   : > { %v761_v59 = vadd.f32 %v760_v1, %v661_v2 }
 0x125   : > { %722 = vadd.xlane.f32.xlu1 %v721_v52 }
 0x126   : > { %v762_v19 = vadd.f32 %v761_v59, %v662_v27 }
 0x128   : > { %v763_v58 = vadd.f32 %v762_v19, %v663_v28 }
 0x12a   : > { %v764_v48 = vadd.f32 %v763_v58, %v664_v29 }
 0x12c   : > { %v765_v12 = vadd.f32 %v764_v48, %v665_v30 }
 0x12e   : > { %v766_v62 = vadd.f32 %v765_v12, %v666_v31 }
 0x130   : > { %v767_v5 = vadd.f32 %v766_v62, %v667_v32 }
 0x132   : > { %v768_v3 = vadd.f32 %v767_v5, %v668_v33 }
 0x134   : > { %v769_v55 = vadd.f32 %v768_v3, %v669_v22 }
 0x136   : > { %v770_v61 = vadd.f32 %v769_v55, %v670_v21 }
 0x138   : > { %v771_v36 = vadd.f32 %v770_v61, %v671_v42 }
 0x13a   : > { %v772_v49 = vadd.f32 %v771_v36, %v672_v57 }
 0x13c   : > { %773 = vadd.xlane.f32.xlu1 %v772_v49 }
 0x1b2   : > { %v723_v54 = vpop.xlane.xlu1 %722 }
 0x1b3   : > { %v777_v7 = vadd.f32 %v775_v37, %v723_v54 }
 0x1b5   : > { %780 = vst.msk [vmem:[#allocation2] sm:$0xff] %vm779_vm0, %v777_v7 }
 0x1bc   : > { %v786_v39 = vld [vmem:[#allocation2] sm:$0xff] (!%p914_p7) }
 0x1bd   : > { %983 = vlog2.f32 (!%p914_p7), %v786_v39 }
 0x1c6   : > { %785 = sbr.rel (%p914_p7) target bundleno = 486 (0x1e6), region = 44 }
 0x1c7   : > { %v984_v40 = vpop.eup (!%p914_p7), %983 }
 0x1c8   : > { %v789_v53 = vmul.f32 (!%p914_p7), 0.6931472, %v984_v40 }
 0x1c9   : > { %v774_v46 = vpop.xlane.xlu1 %773 }
 0x1ca   : > { %v778_v11 = vadd.f32 %v776_v38, %v774_v46  ;;  %v792_v0 = vsub.f32 (!%p914_p7), 0.0, %v789_v53 }
 0x1cc   : > { %781 = vst.msk [vmem:[#allocation2 + $0x8] sm:$0xff] %vm779_vm0, %v778_v11  ;;  %v796_v45 = vmul.f32 (!%p914_p7), %v794_v6, %v792_v0 }
 0x1ce   : > { %798 = vst.msk [vmem:[%s1928_s3] sm:$0xff] %vm779_vm0, %v796_v45 }
 0x1d3   : > { %v787_v4 = vld [vmem:[#allocation2 + $0x8] sm:$0xff] }
 0x1d4   : > { %985 = vlog2.f32 %v787_v4 }
 0x1de   : > { %v986_v16 = vpop.eup %985 }
 0x1df   : > { %v791_v44 = vmul.f32 0.6931472, %v986_v16 }
 0x1e1   : > { %v793_v14 = vsub.f32 0.0, %v791_v44 }
 0x1e3   : > { %v797_v18 = vmul.f32 %v795_v15, %v793_v14 }
 0x1e5   : > { %799 = vst.msk [vmem:[%s1928_s3 + $0x8] sm:$0xff] %vm779_vm0, %v797_v18 }
 0x1e6 PF: > { %s16_s17 = sadd.s32 1, %s1067_s17   ;;  %s1957_s12 = smov %s1051_s13 }
 0x1e7   : > { %p13_p9 = scmp.ge.s32.totalorder %s16_s17, 7   ;;  %s1958_s13 = smov %s1055_s14 }
 0x1e8   : > { %s1959_s14 = smov %s1140_s23  ;;  %s1960_s15 = smov %s1063_s16 }
 0x1e9   : > { %s1961_s16 = smov %s1963_s19  ;;  %15 = sbr.rel (!%p13_p9) target bundleno = 4 (0x4), region = 86 }
 0x1f0   :  { %822 = vsyncpa [#allocation4], 1 }
 0x1f1   :  { %824 = vsyncpa [#allocation4 + $0x1], 1 }

</bundles_post_ra>
